<compile_context>
chip_gen: v6e
topology: v6e:2x2x1
jax: 0.10.0
libtpu: 0.0.40
codegen_flags: <defaults>
</compile_context>

<pallas_src>
import jax
import jax.numpy as jnp
from jax.experimental import pallas as pl
from jax.experimental.pallas import tpu as pltpu

LANE = 128


def _round_up(x, m):
    return ((x + m - 1) // m) * m


def _vmem_budget_bytes():
    """~75% of this generation's physical VMEM (falls back to v7x's 64 MiB)."""
    cap = 64 << 20
    try:
        info = pltpu.get_tpu_info()
        cap = int(getattr(info, "vmem_capacity_bytes", cap)) or cap
    except Exception:
        pass
    return int(0.75 * cap)


def _nvdm_encoder_kernel(x_ref, w1_ref, b1_ref, w2_ref, b2_ref,
                         wh_ref, bh_ref, out_ref, h1_acc):
    k = pl.program_id(1)

    @pl.when(k == 0)
    def _():
        # Seed the accumulator with b1 (removes the bias add from the epilogue).
        h1_acc[...] = jnp.broadcast_to(b1_ref[...], h1_acc.shape)

    # Partial product of the first (vocab-tiled) matmul: bf16 in, f32 accumulate.
    h1_acc[...] += jnp.dot(x_ref[...], w1_ref[...],
                           preferred_element_type=jnp.float32)

    @pl.when(k == pl.num_programs(1) - 1)
    def _():
        h1 = jnp.maximum(h1_acc[...], 0.0)                              # ReLU(mlp1)
        h2 = jnp.dot(h1, w2_ref[...],
                     preferred_element_type=jnp.float32) + b2_ref[...]
        h2 = jnp.maximum(h2, 0.0)                                       # ReLU(mlp2)
        # Fused [mean | logsigma] head: one lane-dense (tb, Cp) matmul + store.
        heads = jnp.dot(h2, wh_ref[...],
                        preferred_element_type=jnp.float32) + bh_ref[...]
        out_ref[...] = heads.astype(out_ref.dtype)


def nvdm_encoder_forward(x, params, *, k_tile_target=2048, batch_tile_target=256):
    """x: (B, word_size) float32. params in (in_features, out_features) layout."""
    B, word_size = x.shape
    hidden = params["w1"].shape[1]
    topic_num = params["wm"].shape[1]

    f32, bf16 = 4, 2
    budget = _vmem_budget_bytes()

    # ---- lane padding of the small feature dims --------------------------
    Hp = _round_up(hidden, LANE)            # hidden
    Cp = _round_up(2 * topic_num, LANE)     # fused [mean|logsigma] head width

    # ---- vocab (reduction) tiling ----------------------------------------
    # Cap tk so the double-buffered (tk, Hp) bf16 W1 block stays <= budget/4.
    tk_cap = max(LANE, ((budget // 4) // (Hp * bf16 * 2)) // LANE * LANE)
    k_target = min(k_tile_target, tk_cap)
    if word_size <= k_target:
        tk = Kp = _round_up(word_size, LANE)     # whole (padded) vocab: W1 resident
    else:
        Kp = _round_up(word_size, 512)
        tk = LANE
        for cand in range(k_target, LANE - 1, -LANE):
            if Kp % cand == 0:
                tk = cand
                break
    nk = Kp // tk

    # ---- batch tiling (bounded by the VMEM budget) ------------------------
    sub = 16 if B >= 16 else 8               # bf16 sublane packing for the x tile
    fixed = 2 * tk * Hp * bf16               # W1 block, double-buffered
    fixed += 2 * (Hp * Hp + Hp * Cp) * f32   # w2, wh, double-buffered
    fixed += 2 * (2 * 8 * Hp + 8 * Cp) * f32  # biases (sublane-padded), double-buffered
    per_row = 2 * tk * bf16 + 2 * Cp * f32 + Hp * f32   # x + out (dbl-buf) + scratch
    avail = budget - fixed
    tb_cap = max(sub, min(1024, (max(avail, 0) // per_row) // sub * sub))

    if nk == 1 and B >= 2 * sub:
        # W1 resident: keep >=2 batch tiles so v7x's second TensorCore gets work.
        tb = min(tb_cap, batch_tile_target, _round_up(-(-B // 2), sub))
    else:
        # W1 streamed once per batch tile: minimize the number of batch tiles.
        tb = min(tb_cap, max(_round_up(B, sub), sub))
    Bp = _round_up(B, tb)
    nb = Bp // tb

    # ---- pad + cast operands in the wrapper -------------------------------
    def pad2(a, r, c):
        ar, ac = a.shape
        return a if (ar == r and ac == c) else jnp.pad(a, ((0, r - ar), (0, c - ac)))

    x_p = pad2(x, Bp, Kp).astype(jnp.bfloat16)
    w1_p = pad2(params["w1"], Kp, Hp).astype(jnp.bfloat16)
    b1_p = pad2(params["b1"], 1, Hp)
    w2_p = pad2(params["w2"], Hp, Hp)
    b2_p = pad2(params["b2"], 1, Hp)
    wh_p = pad2(jnp.concatenate([params["wm"], params["ws"]], axis=1), Hp, Cp)
    bh_p = pad2(jnp.concatenate([params["bm"], params["bs"]], axis=1), 1, Cp)

    const = lambda i, k: (0, 0)              # resident small operands
    in_specs = [
        pl.BlockSpec((tb, tk), lambda i, k: (i, k)),   # x   (bf16, tiled B,K)
        pl.BlockSpec((tk, Hp), lambda i, k: (k, 0)),   # W1  (bf16; resident if nk==1)
        pl.BlockSpec((1, Hp), const),                  # b1
        pl.BlockSpec((Hp, Hp), const),                 # w2
        pl.BlockSpec((1, Hp), const),                  # b2
        pl.BlockSpec((Hp, Cp), const),                 # wh = [wm | ws]
        pl.BlockSpec((1, Cp), const),                  # bh = [bm | bs]
    ]
    out_spec = pl.BlockSpec((tb, Cp), lambda i, k: (i, 0))

    fused = pl.pallas_call(
        _nvdm_encoder_kernel,
        out_shape=jax.ShapeDtypeStruct((Bp, Cp), jnp.float32),
        grid_spec=pltpu.PrefetchScalarGridSpec(
            num_scalar_prefetch=0,
            grid=(nb, nk),
            in_specs=in_specs,
            out_specs=out_spec,
            scratch_shapes=[pltpu.VMEM((tb, Hp), jnp.float32)],
        ),
        compiler_params=pltpu.CompilerParams(
            dimension_semantics=("parallel", "arbitrary"),
            vmem_limit_bytes=int(min(budget, 100 << 20))),
    )(x_p, w1_p, b1_p, w2_p, b2_p, wh_p, bh_p)

    mean = fused[:B, :topic_num]
    logsigma = fused[:B, topic_num:2 * topic_num]
    return mean, logsigma


def init_params(key, word_size, hidden_size, topic_num):
    """nn.Linear default init (uniform +-1/sqrt(fan_in)), stored as (in, out).
    logsigma layer is zeroed as in the module's __init__ (kept as a real matmul
    via the fused head, since training would make it nonzero)."""
    k1, k2, k3, k4, k5, k6 = jax.random.split(key, 6)

    def linear(kw, kb, fan_in, fan_out):
        bound = 1.0 / jnp.sqrt(fan_in)
        w = jax.random.uniform(kw, (fan_in, fan_out), jnp.float32, -bound, bound)
        b = jax.random.uniform(kb, (1, fan_out), jnp.float32, -bound, bound)
        return w, b

    w1, b1 = linear(k1, k2, word_size, hidden_size)
    w2, b2 = linear(k3, k4, hidden_size, hidden_size)
    wm, bm = linear(k5, k6, hidden_size, topic_num)
    ws = jnp.zeros((hidden_size, topic_num), jnp.float32)
    bs = jnp.zeros((1, topic_num), jnp.float32)
    return dict(w1=w1, b1=b1, w2=w2, b2=b2, wm=wm, bm=bm, ws=ws, bs=bs)


def reference_forward(x, p):
    h1 = jnp.maximum(x @ p["w1"] + p["b1"], 0.0)
    h2 = jnp.maximum(h1 @ p["w2"] + p["b2"], 0.0)
    return h2 @ p["wm"] + p["bm"], h2 @ p["ws"] + p["bs"]


if __name__ == "__main__":
    key = jax.random.PRNGKey(0)
    kx, kp = jax.random.split(key)

    # Deliberately non-aligned NVDM-ish shapes: exercises batch/vocab/hidden/
    # head zero-padding and the K-tiled accumulation path (nk > 1).
    batch, word_size, hidden_size, topic_num = 30, 3000, 100, 50

    x = jax.random.uniform(kx, (batch, word_size), jnp.float32)
    params = init_params(kp, word_size, hidden_size, topic_num)

    mean, logsigma = nvdm_encoder_forward(x, params)
    jax.block_until_ready((mean, logsigma))

    ref_mean, ref_logsigma = reference_forward(x, params)
    assert mean.shape == (batch, topic_num)
    assert logsigma.shape == (batch, topic_num)
    # bf16 x/W1 on the first matmul (f32 accumulate) -> slightly looser tolerance.
    assert jnp.allclose(mean, ref_mean, atol=2e-2, rtol=2e-2)
    assert jnp.allclose(logsigma, ref_logsigma, atol=2e-2, rtol=2e-2)

    print("KERNEL_OK")
</pallas_src>

<mosaic_0001>
module attributes {stable_mosaic.version = 11 : i64} {
  func.func @_nvdm_encoder_kernel(%arg0: i32, %arg1: i32, %arg2: memref<32x1536xbf16, #tpu.memory_space<vmem>>, %arg3: memref<1536x128xbf16, #tpu.memory_space<vmem>>, %arg4: memref<1x128xf32, #tpu.memory_space<vmem>>, %arg5: memref<128x128xf32, #tpu.memory_space<vmem>>, %arg6: memref<1x128xf32, #tpu.memory_space<vmem>>, %arg7: memref<128x128xf32, #tpu.memory_space<vmem>>, %arg8: memref<1x128xf32, #tpu.memory_space<vmem>>, %arg9: memref<32x128xf32, #tpu.memory_space<vmem>>, %arg10: memref<32x128xf32, #tpu.memory_space<vmem>>) attributes {dimension_semantics = [#tpu.dimension_semantics<parallel>, #tpu.dimension_semantics<arbitrary>], iteration_bounds = array<i64: 1, 2>, scalar_prefetch = 0 : i64, scratch_operands = 1 : i64, tpu.core_type = #tpu.core_type<tc>, window_params = [{transform_indices = @transform_0, window_bounds = array<i64: 32, 1536>}, {transform_indices = @transform_1, window_bounds = array<i64: 1536, 128>}, {pipeline_mode = #tpu.pipeline_mode<synchronous>, transform_indices = @transform_2, window_bounds = array<i64: 1, 128>}, {pipeline_mode = #tpu.pipeline_mode<synchronous>, transform_indices = @transform_3, window_bounds = array<i64: 128, 128>}, {pipeline_mode = #tpu.pipeline_mode<synchronous>, transform_indices = @transform_4, window_bounds = array<i64: 1, 128>}, {pipeline_mode = #tpu.pipeline_mode<synchronous>, transform_indices = @transform_5, window_bounds = array<i64: 128, 128>}, {pipeline_mode = #tpu.pipeline_mode<synchronous>, transform_indices = @transform_6, window_bounds = array<i64: 1, 128>}, {transform_indices = @transform_7, window_bounds = array<i64: 32, 128>}]} {
    %c0_i32 = arith.constant 0 : i32
    %0 = arith.cmpi eq, %arg1, %c0_i32 : i32
    %1 = arith.extui %0 : i1 to i32
    %c0_i32_0 = arith.constant 0 : i32
    %2 = arith.cmpi ne, %1, %c0_i32_0 : i32
    scf.if %2 {
      %c0_9 = arith.constant 0 : index
      %c0_10 = arith.constant 0 : index
      %12 = vector.load %arg4[%c0_9, %c0_10] : memref<1x128xf32, #tpu.memory_space<vmem>>, vector<1x128xf32>
      %13 = vector.shape_cast %12 : vector<1x128xf32> to vector<1x128xf32>
      %14 = vector.broadcast %13 : vector<1x128xf32> to vector<32x128xf32>
      %c0_11 = arith.constant 0 : index
      %c0_12 = arith.constant 0 : index
      %15 = vector.load %arg10[%c0_11, %c0_12] : memref<32x128xf32, #tpu.memory_space<vmem>>, vector<32x128xf32>
      tpu.vector_store %arg10[%c0_11, %c0_12], %14 {strides = array<i32>} : memref<32x128xf32, #tpu.memory_space<vmem>>, vector<32x128xf32>,
    } else {
    }
    %c0 = arith.constant 0 : index
    %c0_1 = arith.constant 0 : index
    %3 = vector.load %arg10[%c0, %c0_1] : memref<32x128xf32, #tpu.memory_space<vmem>>, vector<32x128xf32>
    %c0_2 = arith.constant 0 : index
    %c0_3 = arith.constant 0 : index
    %4 = vector.load %arg2[%c0_2, %c0_3] : memref<32x1536xbf16, #tpu.memory_space<vmem>>, vector<32x1536xbf16>
    %c0_4 = arith.constant 0 : index
    %c0_5 = arith.constant 0 : index
    %5 = vector.load %arg3[%c0_4, %c0_5] : memref<1536x128xbf16, #tpu.memory_space<vmem>>, vector<1536x128xbf16>
    %cst = arith.constant dense<0.000000e+00> : vector<32x128xf32>
    %6 = tpu.matmul %4, %5, %cst {dimension_numbers = #tpu.dot_dimension_numbers<[1], [0], [0], [1], [0, 0, 1, 1], [], []>} : vector<32x1536xbf16>, vector<1536x128xbf16>, vector<32x128xf32> -> vector<32x128xf32>
    %7 = arith.addf %3, %6 : vector<32x128xf32>
    %c0_6 = arith.constant 0 : index
    %c0_7 = arith.constant 0 : index
    %8 = vector.load %arg10[%c0_6, %c0_7] : memref<32x128xf32, #tpu.memory_space<vmem>>, vector<32x128xf32>
    tpu.vector_store %arg10[%c0_6, %c0_7], %7 {strides = array<i32>} : memref<32x128xf32, #tpu.memory_space<vmem>>, vector<32x128xf32>,
    %c1_i32 = arith.constant 1 : i32
    %9 = arith.cmpi eq, %arg1, %c1_i32 : i32
    %10 = arith.extui %9 : i1 to i32
    %c0_i32_8 = arith.constant 0 : i32
    %11 = arith.cmpi ne, %10, %c0_i32_8 : i32
    scf.if %11 {
      %c0_9 = arith.constant 0 : index
      %c0_10 = arith.constant 0 : index
      %12 = vector.load %arg10[%c0_9, %c0_10] : memref<32x128xf32, #tpu.memory_space<vmem>>, vector<32x128xf32>
      %cst_11 = arith.constant 0.000000e+00 : f32
      %13 = vector.broadcast %cst_11 : f32 to vector<32x128xf32>
      %14 = arith.maximumf %12, %13 : vector<32x128xf32>
      %c0_12 = arith.constant 0 : index
      %c0_13 = arith.constant 0 : index
      %15 = vector.load %arg5[%c0_12, %c0_13] : memref<128x128xf32, #tpu.memory_space<vmem>>, vector<128x128xf32>
      %cst_14 = arith.constant dense<0.000000e+00> : vector<32x128xf32>
      %16 = tpu.matmul %14, %15, %cst_14 {dimension_numbers = #tpu.dot_dimension_numbers<[1], [0], [0], [1], [0, 0, 1, 1], [], []>} : vector<32x128xf32>, vector<128x128xf32>, vector<32x128xf32> -> vector<32x128xf32>
      %c0_15 = arith.constant 0 : index
      %c0_16 = arith.constant 0 : index
      %17 = vector.load %arg6[%c0_15, %c0_16] : memref<1x128xf32, #tpu.memory_space<vmem>>, vector<1x128xf32>
      %18 = vector.broadcast %17 : vector<1x128xf32> to vector<32x128xf32>
      %19 = arith.addf %16, %18 : vector<32x128xf32>
      %cst_17 = arith.constant 0.000000e+00 : f32
      %20 = vector.broadcast %cst_17 : f32 to vector<32x128xf32>
      %21 = arith.maximumf %19, %20 : vector<32x128xf32>
      %c0_18 = arith.constant 0 : index
      %c0_19 = arith.constant 0 : index
      %22 = vector.load %arg7[%c0_18, %c0_19] : memref<128x128xf32, #tpu.memory_space<vmem>>, vector<128x128xf32>
      %cst_20 = arith.constant dense<0.000000e+00> : vector<32x128xf32>
      %23 = tpu.matmul %21, %22, %cst_20 {dimension_numbers = #tpu.dot_dimension_numbers<[1], [0], [0], [1], [0, 0, 1, 1], [], []>} : vector<32x128xf32>, vector<128x128xf32>, vector<32x128xf32> -> vector<32x128xf32>
      %c0_21 = arith.constant 0 : index
      %c0_22 = arith.constant 0 : index
      %24 = vector.load %arg8[%c0_21, %c0_22] : memref<1x128xf32, #tpu.memory_space<vmem>>, vector<1x128xf32>
      %25 = vector.broadcast %24 : vector<1x128xf32> to vector<32x128xf32>
      %26 = arith.addf %23, %25 : vector<32x128xf32>
      %c0_23 = arith.constant 0 : index
      %c0_24 = arith.constant 0 : index
      %27 = vector.load %arg9[%c0_23, %c0_24] : memref<32x128xf32, #tpu.memory_space<vmem>>, vector<32x128xf32>
      tpu.vector_store %arg9[%c0_23, %c0_24], %26 {strides = array<i32>} : memref<32x128xf32, #tpu.memory_space<vmem>>, vector<32x128xf32>,
    } else {
    }
    return
  }
  func.func @transform_0(%arg0: i32, %arg1: i32) -> (i32, i32) {
    %c0_i32 = arith.constant 0 : i32
    return %arg0, %arg1 : i32, i32
  }
  func.func @transform_1(%arg0: i32, %arg1: i32) -> (i32, i32) {
    %c0_i32 = arith.constant 0 : i32
    %c0_i32_0 = arith.constant 0 : i32
    return %arg1, %c0_i32 : i32, i32
  }
  func.func @transform_2(%arg0: i32, %arg1: i32) -> (i32, i32) {
    %c0_i32 = arith.constant 0 : i32
    %c0_i32_0 = arith.constant 0 : i32
    %c0_i32_1 = arith.constant 0 : i32
    return %c0_i32, %c0_i32_0 : i32, i32
  }
  func.func @transform_3(%arg0: i32, %arg1: i32) -> (i32, i32) {
    %c0_i32 = arith.constant 0 : i32
    %c0_i32_0 = arith.constant 0 : i32
    %c0_i32_1 = arith.constant 0 : i32
    return %c0_i32, %c0_i32_0 : i32, i32
  }
  func.func @transform_4(%arg0: i32, %arg1: i32) -> (i32, i32) {
    %c0_i32 = arith.constant 0 : i32
    %c0_i32_0 = arith.constant 0 : i32
    %c0_i32_1 = arith.constant 0 : i32
    return %c0_i32, %c0_i32_0 : i32, i32
  }
  func.func @transform_5(%arg0: i32, %arg1: i32) -> (i32, i32) {
    %c0_i32 = arith.constant 0 : i32
    %c0_i32_0 = arith.constant 0 : i32
    %c0_i32_1 = arith.constant 0 : i32
    return %c0_i32, %c0_i32_0 : i32, i32
  }
  func.func @transform_6(%arg0: i32, %arg1: i32) -> (i32, i32) {
    %c0_i32 = arith.constant 0 : i32
    %c0_i32_0 = arith.constant 0 : i32
    %c0_i32_1 = arith.constant 0 : i32
    return %c0_i32, %c0_i32_0 : i32, i32
  }
  func.func @transform_7(%arg0: i32, %arg1: i32) -> (i32, i32) {
    %c0_i32 = arith.constant 0 : i32
    %c0_i32_0 = arith.constant 0 : i32
    return %arg0, %c0_i32 : i32, i32
  }
}

</mosaic_0001>

<bundles_post_ra>
// kernel: tpu_custom_call.1
= control target key start
LH: loop header
LB: loop body
LE: loop exit
PB: predicated region body
PF: predicated region fallthrough
CT: control target
= control target key end

     0   :  { %s3185_s0 = inlined_call_operand.hbm [shape: bf16[32,3072], index: 0, kind: input, shape index: {}]   ;;  %s3186_s1 = inlined_call_operand.hbm [shape: bf16[3072,128], index: 1, kind: input, shape index: {}]   ;;  %s3187_s2 = inlined_call_operand.vmem [shape: f32[1,128], index: 2, kind: input, shape index: {}]   ;;  %s3188_s3 = inlined_call_operand.hbm [shape: f32[128,128], index: 3, kind: input, shape index: {}]   ;;  %s3189_s4 = inlined_call_operand.vmem [shape: f32[1,128], index: 4, kind: input, shape index: {}]   ;;  %s3190_s5 = inlined_call_operand.hbm [shape: f32[128,128], index: 5, kind: input, shape index: {}]   ;;  %s3191_s6 = inlined_call_operand.vmem [shape: f32[1,128], index: 6, kind: input, shape index: {}]   ;;  %s3192_s7 = inlined_call_operand.hbm [shape: f32[32,128], index: 7, kind: output, shape index: {}]  }
   0x1   :  { %3197 = sst [smem:[#allocation20_spill]] %s3185_s0 }
   0x2   :  { %3198 = sst [smem:[#allocation21_spill]] %s3188_s3 }
   0x3   :  { %3199 = sst [smem:[#allocation22_spill]] %s3190_s5 }
   0x4   :  { %3200 = sst [smem:[#allocation23_spill]] %s3192_s7 }
   0x5   :  { %12 = vsyncpa [#allocation4], 0 }
   0x6   :  { %14 = vsyncpa [#allocation4 + $0x1], 0 }
   0x7   :  { %15 = vsyncpa [#allocation7], 0 }
   0x8   :  { %17 = vsyncpa [#allocation7 + $0x1], 0 }
   0x9   :  { %18 = vsyncpa [#allocation10], 0 }
   0xa   :  { %19 = vsyncpa [#allocation5], 0  ;;  %s2880_s24 = smov 0   ;;  %s2882_s25 = smov 0  }
   0xb   :  { %s2884_s26 = smov 0   ;;  %s2886_s27 = smov 0  }
   0xc   :  { %s2888_s28 = smov 0   ;;  %s2890_s29 = smov 0  }
   0xd LB: > { %3201 = sst [smem:[#allocation17_spill]] %s2812_s26  ;;  %s2909_s30 = sadd.s32 4294967295, %s2824_s29   ;;  %s2824_s29 = sphi %s2890_s29, %s25_s29   ;;  %s2820_s28 = sphi %s2888_s28, %s3223_s28   ;;  %s2816_s27 = sphi %s2886_s27, %s3222_s27   ;;  %s2812_s26 = sphi %s2884_s26, %s3218_s26   ;;  %s2808_s25 = sphi %s2882_s25, %s3221_s25   ;;  %s2804_s24 = sphi %s2880_s24, %s3220_s24  }
   0xe   : > { %s46_s8 = sadd.s32 1, %s2812_s26  ;;  %p53_p0 = scmp.ne.s32.totalorder %s2812_s26, %s2808_s25 }
   0xf   : > { %p54_p1 = scmp.eq.s32.totalorder %s2824_s29, 0  ;;  %p59_p2 = scmp.ne.s32.totalorder %s2808_s25, %s2804_s24 }
  0x10   : > { %p3193_p3 = scmp.eq.s32.totalorder %s2909_s30, 0  ;;  %p1969_p5 = scmp.ge.s32.totalorder %s2824_s29, 1 }
  0x11   : > { %p55_p4 = por %p54_p1, %p53_p0  ;;  %p227_p7 = scmp.lt.s32.totalorder %s2824_s29, 3 }
  0x12   : > { %p2920_p6 = por %p3193_p3, %p59_p2  ;;  %s2826_s11 = smov [#allocation8]  }
  0x13   : > { %p2925_p8 = pnand %p1969_p5, %p227_p7  ;;  %s242_s12 = sshll.u32 %s2826_s11, 4  ;;  %s243_s12 = int_to_ptr.vmem [resolvable:$true] %s242_s12 }
  0x14   : > { %s3202_s9 = scalar_select %p2920_p6, 1, 0 }
  0x15   : > { %p2413_p9 = pneg %p2925_p8  ;;  %p2429_p10 = scmp.lt.s32.totalorder %s2824_s29, 2 }
  0x16   : > { %s2827_s15 = smov [#allocation9]   ;;  %s2637_s17 = scalar_lea.vmem %s243_s12, 2048 }
  0x17   : > { %p2934_p11 = pnand %p2413_p9, %p3193_p3  ;;  %p2938_p12 = pnand %p2429_p10, %p55_p4 }
  0x18   : > { %s258_s16 = sshll.u32 %s2827_s15, 4  ;;  %p2638_p0 = scmp.ne.s32.totalorder %s243_s12, %s2637_s17  ;;  %s259_s16 = int_to_ptr.vmem [resolvable:$true] %s258_s16 }
  0x19   : > { %p2628_p13 = pneg %p2934_p11  ;;  %p2645_p5 = scmp.lt.s32.totalorder %s243_s12, %s243_s12 }
  0x1a   : > { %p2646_p7 = scmp.lt.s32.totalorder %s2637_s17, %s2637_s17 }
  0x1b   : > { %p2640_p1 = pnand %p2638_p0, %p2628_p13 }
  0x1c   : > { %p2647_p9 = por %p2646_p7, %p2645_p5 }
  0x1d   : > { %p2641_p2 = pneg %p2640_p1 }
  0x1f   : > { %p2648_p3 = pnand %p2647_p9, %p2641_p2 }
  0x21   : > { %2651 = shalt.err (!%p2648_p3)
}
  0x22   : > { %s2828_s18 = smov 128   ;;  %s2829_s19 = smov 8  }
  0x23   : > { %s3206_s3 = sld [smem:[#allocation21_spill]]  ;;  %s2663_s22 = scalar_lea.vmem %s259_s16, 2048 }
  0x24   : > { %p2664_p4 = scmp.ne.s32.totalorder %s259_s16, %s2663_s22  ;;  %p2671_p1 = scmp.lt.s32.totalorder %s259_s16, %s259_s16 }
  0x25   : > { %p2672_p6 = scmp.lt.s32.totalorder %s2663_s22, %s2663_s22 }
  0x26   : > { %p2666_p10 = pnand %p2664_p4, %p2628_p13 }
  0x27   : > { %p2673_p5 = por %p2672_p6, %p2671_p1 }
  0x28   : > { %p2667_p0 = pneg %p2666_p10 }
  0x29   : > { %2416 = dma.hbm_to_vmem [thread:$0]  (!%p2934_p11), %s3206_s3, 2048, %s243_s12, [#allocation7], %s2828_s18, %s2828_s18, %s2829_s19  }
  0x2a   : > { %p2674_p2 = pnand %p2673_p5, %p2667_p0 }
  0x2c   : > { %2677 = shalt.err (!%p2674_p2)
}
  0x2d   : > { %s3207_s5 = sld [smem:[#allocation22_spill]]  ;;  %s2961_s11 = sand.u32 1, %s2812_s26  }
  0x2e   : > { %s34_s12 = sadd.s32 1, %s2820_s28  ;;  %s2393_s15 = smul.u32 192, %s2961_s11 }
  0x2f   : > { %p35_p3 = scmp.ge.s32.totalorder %s34_s12, 2  ;;  %s2107_s13 = smul.u32 768, %s2820_s28 }
  0x30   : > { %s3209_s0 = sld [smem:[#allocation20_spill]]  ;;  %s279_s23 = scalar_lea.vmem [#allocation3], %s2393_s15 }
  0x31   : > { %s3225_s12 = smov (%p35_p3, %s34_s12), 0  ;;  %s2830_s17 = smov [#allocation3]  }
  0x32   : > { %3208 = sst [smem:[#allocation18_spill]] %s3225_s12  ;;  %s42_s22 = ssub.s32 %s2820_s28, %s3225_s12 }
  0x33   : > { %2419 = dma.hbm_to_vmem [thread:$0]  (!%p2934_p11), %s3207_s5, 2048, %s259_s16, [#allocation10], %s2828_s18, %s2828_s18, %s2829_s19  }
  0x34   : > { %s289_s16 = sshll.u32 %s279_s23, 4  ;;  %p44_p6 = scmp.eq.s32.totalorder %s42_s22, 0  ;;  %s290_s16 = int_to_ptr.vmem [resolvable:$true] %s289_s16 }
  0x35   : > { %s276_s19 = scalar_lea.sflag [#allocation4], %s2961_s11  ;;  %p2680_p11 = pneg %p2938_p12 }
  0x36   : > { %s2971_s21 = scalar_lea.hbm %s3209_s0, %s2107_s13  ;;  %s2691_s24 = scalar_lea.vmem %s290_s16, 3072 }
  0x37   : > { %s2978_s18 = scalar_select %p44_p6, %s2812_s26, %s46_s8  }
  0x38   : > { %p2692_p13 = scmp.ne.s32.totalorder %s290_s16, %s2691_s24  ;;  %s2696_s13 = sshll.u32 %s2830_s17, 4  ;;  %s2697_s13 = int_to_ptr.vmem [resolvable:$false] %s2696_s13 }
  0x39   : > { %3210 = sst [smem:[#allocation19_spill]] %s2978_s18  ;;  %s2698_s20 = scalar_lea.vmem %s2697_s13, 6144 }
  0x3a   : > { %p2694_p7 = pnand %p2692_p13, %p2680_p11  ;;  %p2699_p4 = scmp.lt.s32.totalorder %s290_s16, %s2697_s13 }
  0x3b   : > { %p2700_p10 = scmp.lt.s32.totalorder %s2698_s20, %s2691_s24 }
  0x3c   : > { %p2695_p9 = pneg %p2694_p7 }
  0x3d   : > { %p2701_p0 = por %p2700_p10, %p2699_p4 }
  0x3f   : > { %p2702_p1 = pnand %p2701_p0, %p2695_p9 }
  0x41   : > { %2705 = shalt.err (!%p2702_p1)
}
  0x42   : > { %s2831_s8 = smov 1536   ;;  %s2832_s15 = smov 768  }
  0x43   : > { %s2833_s22 = smov 48   ;;  %s299_s23 = sand.u32 1, %s2824_s29  }
  0x44   : > { %2423 = dma.hbm_to_vmem [thread:$0]  (!%p2938_p12), %s2971_s21, 3072, %s290_s16, %s276_s19, %s2831_s8, %s2832_s15, %s2833_s22  }
  0x45   : > { %s2394_s17 = smul.u32 768, %s2961_s11  ;;  %s300_s12 = scalar_lea.sflag [#allocation7], %s299_s23 }
  0x46   : > { %s2108_s0 = smul.u32 12288, %s2820_s28  ;;  %s2834_s26 = smov [#allocation6]  }
  0x47   : > { %s303_s20 = scalar_lea.vmem [#allocation6], %s2394_s17  ;;  %s2724_s7 = sshll.u32 %s2834_s26, 4  ;;  %s2725_s7 = int_to_ptr.vmem [resolvable:$false] %s2724_s7 }
  0x48   : > { %s309_s24 = scalar_lea.hbm %s3186_s1, %s2108_s0  ;;  %s310_s5 = sshll.u32 %s303_s20, 4  ;;  %s311_s5 = int_to_ptr.vmem [resolvable:$true] %s310_s5 }
  0x49   : > { %s2719_s18 = scalar_lea.vmem %s311_s5, 12288  ;;  %s2726_s21 = scalar_lea.vmem %s2725_s7, 24576 }
  0x4a   : > { %p2720_p5 = scmp.ne.s32.totalorder %s311_s5, %s2719_s18  ;;  %p2727_p6 = scmp.lt.s32.totalorder %s311_s5, %s2725_s7 }
  0x4b   : > { %p2728_p13 = scmp.lt.s32.totalorder %s2726_s21, %s2719_s18 }
  0x4c   : > { %p2722_p2 = pnand %p2720_p5, %p2680_p11 }
  0x4d   : > { %p2729_p7 = por %p2728_p13, %p2727_p6 }
  0x4e   : > { %p2723_p3 = pneg %p2722_p2 }
  0x50   : > { %p2730_p9 = pnand %p2729_p7, %p2723_p3 }
  0x52   : > { %2733 = shalt.err (!%p2730_p9)
}
  0x53   : > { %s2835_s0 = smov 64   ;;  %s2836_s3 = smov 4  }
  0x54   : > { %2426 = dma.hbm_to_vmem [thread:$0]  (!%p2938_p12), %s309_s24, 12288, %s311_s5, %s300_s12, %s2835_s0, %s2835_s0, %s2836_s3  }
  0x55   : > { %322 = sbr.rel (%p2925_p8) target bundleno = 882 (0x372), region = 48  ;;  %s324_s11 = sand.u32 (!%p2925_p8), 1, %s2808_s25  }
  0x56   : > { %s2395_s16 = smul.u32 (!%p2925_p8), 192, %s324_s11  ;;  %s325_s26 = scalar_lea.sflag (!%p2925_p8), [#allocation4], %s324_s11 }
  0x57   : > { %p3211_p11 = scmp.ne.s32.totalorder (!%p2925_p8), %s3202_s9, 0 }
  0x58   : > { %s3003_s19 = scalar_lea.vmem (!%p2925_p8), [#allocation3], %s2395_s16 }
  0x5a   : > { %2783 = dma.done.wait (%p3211_p11), %s325_s26, 3072  }
  0x5b   : > { %2785 = vsyncadd (%p3211_p11), %s325_s26, 4294964224  ;;  %s333_s7 = sand.u32 1, %s2909_s30   ;;  %s2396_s14 = smul.u32 768, %s324_s11 }
  0x5c   : > { %s334_s5 = scalar_lea.sflag [#allocation7], %s333_s7 }
  0x5d   : > { %s3010_s12 = scalar_lea.vmem [#allocation6], %s2396_s14 }
  0x5e   : > { %2787 = dma.done.wait (%p3211_p11), %s334_s5, 12288  }
  0x5f   : > { %2789 = vsyncadd (%p3211_p11), %s334_s5, 4294955008  ;;  %p3212_p8 = scmp.eq.s32.totalorder %s2909_s30, 0 }
  0x61   : > { %2791 = dma.done.wait (%p3212_p8), [#allocation7], 2048   ;;  %p3213_p12 = pmov %p3212_p8 }
  0x62   : > { %p3214_p4 = pmov %p3212_p8 }
  0x63   : > { %2793 = vsyncadd (%p3213_p12), [#allocation7], 4294965248 }
  0x64   : > { %2795 = dma.done.wait (%p3214_p4), [#allocation10], 2048   ;;  %p3215_p10 = pmov %p3214_p4 }
  0x65   : > { %p1978_p0 = scmp.ne.s32.totalorder %s2816_s27, 0 }
  0x66   : > { %2797 = vsyncadd (%p3215_p10), [#allocation10], 4294965248 }
  0x67   : > { %384 = sbr.rel (%p1978_p0) target bundleno = 111 (0x6f), region = 68 }
  0x6c   : > { %v1979_v0 = vld [vmem:[%s3187_s2] ss:$0 sm:$0xff] }
  0x6d   : > { %392 = vst [vmem:[#allocation2 + $0x10] sm:$0xff] %v1979_v0  ;;  %393 = vst [vmem:[#allocation2] sm:$0xff] %v1979_v0 }
  0x6e   : > { %394 = vst [vmem:[#allocation2 + $0x18] sm:$0xff] %v1979_v0  ;;  %395 = vst [vmem:[#allocation2 + $0x8] sm:$0xff] %v1979_v0 }
  0x6f PF: > { %v2494_v1 = vld [vmem:[%s3010_s12 + $0x78] sm:$0xff]   ;;  %v2498_v5 = vld [vmem:[%s3010_s12 + $0x70] sm:$0xff]   ;;  %v2502_v9 = vld [vmem:[%s3010_s12 + $0x68] sm:$0xff]   ;;  %p2100_p1 = scmp.ne.s32.totalorder %s2816_s27, 1 }
  0x70   : > { %v2495_v2 = vld [vmem:[%s3010_s12 + $0xf8] sm:$0xff]   ;;  %2109 = vmatprep.subr.bf16.mxu0 %v2494_v1  ;;  %v2499_v6 = vld [vmem:[%s3010_s12 + $0xf0] sm:$0xff]   ;;  %v2503_v10 = vld [vmem:[%s3010_s12 + $0xe8] sm:$0xff]  }
  0x71   : > { %v2496_v3 = vld [vmem:[%s3010_s12 + $0x38] sm:$0xff]   ;;  %2137 = vmatprep.subr.bf16.mxu1 %v2495_v2  ;;  %v2500_v7 = vld [vmem:[%s3010_s12 + $0x30] sm:$0xff]   ;;  %v2504_v11 = vld [vmem:[%s3010_s12 + $0x28] sm:$0xff]  }
  0x72   : > { %v2497_v4 = vld [vmem:[%s3010_s12 + $0xb8] sm:$0xff]   ;;  %2110 = vmatpush3.bf16.msra.mxu0 %v2496_v3  ;;  %v2501_v8 = vld [vmem:[%s3010_s12 + $0xb0] sm:$0xff]   ;;  %v2505_v12 = vld [vmem:[%s3010_s12 + $0xa8] sm:$0xff]  }
  0x73   : > { %2138 = vmatpush3.bf16.msra.mxu1 %v2497_v4  ;;  %2111 = vmatprep.subr.bf16.mxu0 %v2498_v5  ;;  %v2506_v13 = vld [vmem:[%s3010_s12 + $0x60] sm:$0xff]   ;;  %v2510_v17 = vld [vmem:[%s3010_s12 + $0x58] sm:$0xff]   ;;  %v2514_v21 = vld [vmem:[%s3010_s12 + $0x50] sm:$0xff]  }
  0x74   : > { %2139 = vmatprep.subr.bf16.mxu1 %v2499_v6  ;;  %v2507_v14 = vld [vmem:[%s3010_s12 + $0xe0] sm:$0xff]   ;;  %v2511_v18 = vld [vmem:[%s3010_s12 + $0xd8] sm:$0xff]   ;;  %v2515_v22 = vld [vmem:[%s3010_s12 + $0xd0] sm:$0xff]  }
  0x75   : > { %v2508_v15 = vld [vmem:[%s3010_s12 + $0x20] sm:$0xff]   ;;  %v2512_v19 = vld [vmem:[%s3010_s12 + $0x18] sm:$0xff]   ;;  %v2516_v23 = vld [vmem:[%s3010_s12 + $0x10] sm:$0xff]  }
  0x76   : > { %2112 = vmatpush3.bf16.msra.mxu0 %v2500_v7  ;;  %v2509_v16 = vld [vmem:[%s3010_s12 + $0xa0] sm:$0xff]   ;;  %v2513_v20 = vld [vmem:[%s3010_s12 + $0x98] sm:$0xff]   ;;  %v2517_v24 = vld [vmem:[%s3010_s12 + $0x90] sm:$0xff]  }
  0x77   : > { %2140 = vmatpush3.bf16.msra.mxu1 %v2501_v8  ;;  %2113 = vmatprep.subr.bf16.mxu0 %v2502_v9  ;;  %v2518_v25 = vld [vmem:[%s3010_s12 + $0x48] sm:$0xff]   ;;  %v2522_v29 = vld [vmem:[%s3010_s12 + $0x40] sm:$0xff]   ;;  %v2532_v37 = vld [vmem:[%s3010_s12 + $0x178] sm:$0xff]  }
  0x78   : > { %2141 = vmatprep.subr.bf16.mxu1 %v2503_v10  ;;  %v2519_v26 = vld [vmem:[%s3010_s12 + $0xc8] sm:$0xff]   ;;  %v2523_v30 = vld [vmem:[%s3010_s12 + $0xc0] sm:$0xff]   ;;  %v2533_v38 = vld [vmem:[%s3010_s12 + $0x1f8] sm:$0xff]  }
  0x79   : > { %v2520_v27 = vld [vmem:[%s3010_s12 + $0x8] sm:$0xff]   ;;  %v2524_v31 = vld [vmem:[%s3010_s12] sm:$0xff]   ;;  %v2534_v39 = vld [vmem:[%s3010_s12 + $0x138] sm:$0xff]  }
  0x7a   : > { %2114 = vmatpush3.bf16.msra.mxu0 %v2504_v11  ;;  %v2521_v28 = vld [vmem:[%s3010_s12 + $0x88] sm:$0xff]   ;;  %v2525_v32 = vld [vmem:[%s3010_s12 + $0x80] sm:$0xff]   ;;  %v2535_v40 = vld [vmem:[%s3010_s12 + $0x1b8] sm:$0xff]  }
  0x7b   : > { %2142 = vmatpush3.bf16.msra.mxu1 %v2505_v12  ;;  %2115 = vmatprep.subr.bf16.mxu0 %v2506_v13  ;;  %v2526_v33 = vld [vmem:[%s3003_s19] ss:$48 sps:$4 sm:$0xff]   ;;  %v2528_v34 = vld [vmem:[%s3003_s19 + $0x4] ss:$48 sps:$4 sm:$0xff]   ;;  %v2529_v35 = vld [vmem:[%s3003_s19 + $0x8] ss:$48 sps:$4 sm:$0xff]  }
  0x7c   : > { %2143 = vmatprep.subr.bf16.mxu1 %v2507_v14  ;;  %v2531_v36 = vld [vmem:[%s3003_s19 + $0xc] ss:$48 sps:$4 sm:$0xff]   ;;  %1344 = vmatprep.mubr.bf16.mxu0 %v2528_v34  ;;  %v2536_v41 = vld [vmem:[%s3010_s12 + $0x170] sm:$0xff]   ;;  %v2544_v49 = vld [vmem:[%s3010_s12 + $0x160] sm:$0xff]  }
  0x7d   : > { %1393 = vmatprep.mubr.bf16.mxu1 %v2531_v36  ;;  %v2537_v42 = vld [vmem:[%s3010_s12 + $0x1f0] sm:$0xff]   ;;  %v2540_v45 = vld [vmem:[%s3010_s12 + $0x168] sm:$0xff]   ;;  %v2545_v50 = vld [vmem:[%s3010_s12 + $0x1e0] sm:$0xff]  }
  0x7e   : > { %2116 = vmatpush3.bf16.msra.mxu0 %v2508_v15  ;;  %v2538_v43 = vld [vmem:[%s3010_s12 + $0x130] sm:$0xff]   ;;  %v2541_v46 = vld [vmem:[%s3010_s12 + $0x1e8] sm:$0xff]   ;;  %v2546_v51 = vld [vmem:[%s3010_s12 + $0x120] sm:$0xff]  }
  0x7f   : > { %2144 = vmatpush3.bf16.msra.mxu1 %v2509_v16  ;;  %2117 = vmatprep.subr.bf16.mxu0 %v2510_v17  ;;  %v2539_v44 = vld [vmem:[%s3010_s12 + $0x1b0] sm:$0xff]   ;;  %v2542_v47 = vld [vmem:[%s3010_s12 + $0x128] sm:$0xff]   ;;  %v2547_v52 = vld [vmem:[%s3010_s12 + $0x1a0] sm:$0xff]  }
  0x80   : > { %2145 = vmatprep.subr.bf16.mxu1 %v2511_v18  ;;  %v2543_v48 = vld [vmem:[%s3010_s12 + $0x1a8] sm:$0xff]   ;;  %v2548_v53 = vld [vmem:[%s3010_s12 + $0x158] sm:$0xff]   ;;  %v2552_v57 = vld [vmem:[%s3003_s19 + $0x64] ss:$48 sps:$4 sm:$0xff]  }
  0x81   : > { %v2549_v54 = vld [vmem:[%s3010_s12 + $0x1d8] sm:$0xff]   ;;  %v2556_v59 = vld [vmem:[%s3003_s19 + $0x60] ss:$48 sps:$4 sm:$0xff]   ;;  %v2562_v1 = vld [vmem:[%s3010_s12 + $0x148] sm:$0xff]  }
  0x82   : > { %2118 = vmatpush3.bf16.msra.mxu0 %v2512_v19  ;;  %v2550_v55 = vld [vmem:[%s3010_s12 + $0x118] sm:$0xff]   ;;  %v2558_v61 = vld [vmem:[%s3010_s12 + $0x150] sm:$0xff]   ;;  %v2563_v2 = vld [vmem:[%s3010_s12 + $0x1c8] sm:$0xff]  }
  0x83   : > { %2146 = vmatpush3.bf16.msra.mxu1 %v2513_v20  ;;  %2119 = vmatprep.subr.bf16.mxu0 %v2514_v21  ;;  %v2551_v56 = vld [vmem:[%s3010_s12 + $0x198] sm:$0xff]   ;;  %v2559_v62 = vld [vmem:[%s3010_s12 + $0x1d0] sm:$0xff]   ;;  %v2564_v3 = vld [vmem:[%s3010_s12 + $0x108] sm:$0xff]  }
  0x84   : > { %2147 = vmatprep.subr.bf16.mxu1 %v2515_v22  ;;  %v2554_v58 = vld [vmem:[%s3003_s19 + $0x6c] ss:$48 sps:$4 sm:$0xff]   ;;  %v2557_v60 = vld [vmem:[%s3003_s19 + $0x68] ss:$48 sps:$4 sm:$0xff]   ;;  %v2560_v63 = vld [vmem:[%s3010_s12 + $0x110] sm:$0xff]  }
  0x85   : > { %v2561_v0 = vld [vmem:[%s3010_s12 + $0x190] sm:$0xff]   ;;  %v2565_v4 = vld [vmem:[%s3010_s12 + $0x188] sm:$0xff]   ;;  %v2566_v5 = vld [vmem:[%s3010_s12 + $0x140] sm:$0xff]  }
  0x86   : > { %2120 = vmatpush3.bf16.msra.mxu0 %v2516_v23  ;;  %v2567_v6 = vld [vmem:[%s3010_s12 + $0x1c0] sm:$0xff]   ;;  %v2573_v11 = vld [vmem:[%s3003_s19 + $0x18] ss:$48 sps:$4 sm:$0xff]   ;;  %v2575_v12 = vld [vmem:[%s3003_s19 + $0x1c] ss:$48 sps:$4 sm:$0xff]  }
  0x87   : > { %2148 = vmatpush3.bf16.msra.mxu1 %v2517_v24  ;;  %2121 = vmatprep.subr.bf16.mxu0 %v2518_v25  ;;  %v2568_v7 = vld [vmem:[%s3010_s12 + $0x100] sm:$0xff]   ;;  %v2576_v13 = vld [vmem:[%s3010_s12 + $0x278] sm:$0xff]   ;;  %v2580_v17 = vld [vmem:[%s3010_s12 + $0x270] sm:$0xff]  }
  0x88   : > { %2149 = vmatprep.subr.bf16.mxu1 %v2519_v26  ;;  %v2569_v8 = vld [vmem:[%s3010_s12 + $0x180] sm:$0xff]   ;;  %v2577_v14 = vld [vmem:[%s3010_s12 + $0x2f8] sm:$0xff]   ;;  %v2581_v18 = vld [vmem:[%s3010_s12 + $0x2f0] sm:$0xff]  }
  0x89   : > { %v2570_v9 = vld [vmem:[%s3003_s19 + $0x10] ss:$48 sps:$4 sm:$0xff]   ;;  %v2572_v10 = vld [vmem:[%s3003_s19 + $0x14] ss:$48 sps:$4 sm:$0xff]   ;;  %v2578_v15 = vld [vmem:[%s3010_s12 + $0x238] sm:$0xff]  }
  0x8a   : > { %2122 = vmatpush3.bf16.msra.mxu0 %v2520_v27  ;;  %v2579_v16 = vld [vmem:[%s3010_s12 + $0x2b8] sm:$0xff]   ;;  %v2582_v19 = vld [vmem:[%s3010_s12 + $0x230] sm:$0xff]   ;;  %v2587_v23 = vld [vmem:[%s3010_s12 + $0x268] sm:$0xff]  }
  0x8b   : > { %2150 = vmatpush3.bf16.msra.mxu1 %v2521_v28  ;;  %2123 = vmatprep.subr.bf16.mxu0 %v2522_v29  ;;  %v2583_v20 = vld [vmem:[%s3010_s12 + $0x2b0] sm:$0xff]   ;;  %v2588_v24 = vld [vmem:[%s3010_s12 + $0x2e8] sm:$0xff]   ;;  %v2594_v29 = vld [vmem:[%s3010_s12 + $0x260] sm:$0xff]  }
  0x8c   : > { %2151 = vmatprep.subr.bf16.mxu1 %v2523_v30  ;;  %v2584_v21 = vld [vmem:[%s3003_s19 + $0x74] ss:$48 sps:$4 sm:$0xff]   ;;  %v2586_v22 = vld [vmem:[%s3003_s19 + $0x70] ss:$48 sps:$4 sm:$0xff]   ;;  %v2589_v25 = vld [vmem:[%s3003_s19 + $0x7c] ss:$48 sps:$4 sm:$0xff]  }
  0x8d   : > { %v2591_v26 = vld [vmem:[%s3010_s12 + $0x228] sm:$0xff]   ;;  %v2595_v30 = vld [vmem:[%s3010_s12 + $0x2e0] sm:$0xff]   ;;  %v2599_v34 = vld [vmem:[%s3010_s12 + $0x2d8] sm:$0xff]  }
  0x8e   : > { %2124 = vmatpush3.bf16.msra.mxu0 %v2524_v31  ;;  %v2592_v27 = vld [vmem:[%s3010_s12 + $0x2a8] sm:$0xff]   ;;  %v2596_v31 = vld [vmem:[%s3010_s12 + $0x220] sm:$0xff]   ;;  %v2601_v36 = vld [vmem:[%s3010_s12 + $0x298] sm:$0xff]  }
  0x8f   : > { %2152 = vmatpush3.bf16.msra.mxu1 %v2525_v32  ;;  %2165 = vmatprep.subr.bf16.mxu0 %v2532_v37  ;;  %v2593_v28 = vld [vmem:[%s3003_s19 + $0x78] ss:$48 sps:$4 sm:$0xff]   ;;  %v2597_v32 = vld [vmem:[%s3010_s12 + $0x2a0] sm:$0xff]   ;;  %v2602_v37 = vld [vmem:[%s3010_s12 + $0x250] sm:$0xff]  }
  0x90   : > { %2193 = vmatprep.subr.bf16.mxu1 %v2533_v38  ;;  %v2603_v38 = vld [vmem:[%s3010_s12 + $0x2d0] sm:$0xff]  }
  0x91   : > { %1345 = vmatmul.mubr.bf16.vlgmr.msra.gmra.mxu0 %v2526_v33  ;;  %v2598_v33 = vld [vmem:[%s3010_s12 + $0x258] sm:$0xff]  }
  0x92   : > { %1394 = vmatmul.mubr.bf16.vlgmr.msra.gmra.mxu1 %v2529_v35  ;;  %2166 = vmatpush3.bf16.msra.mxu0 %v2534_v39  ;;  %v2600_v35 = vld [vmem:[%s3010_s12 + $0x218] sm:$0xff]   ;;  %v2604_v39 = vld [vmem:[%s3010_s12 + $0x210] sm:$0xff]  }
  0x93   : > { %2194 = vmatpush3.bf16.msra.mxu1 %v2535_v40  ;;  %2167 = vmatprep.subr.bf16.mxu0 %v2536_v41  ;;  %v2605_v40 = vld [vmem:[%s3010_s12 + $0x290] sm:$0xff]   ;;  %v2606_v41 = vld [vmem:[%s3010_s12 + $0x248] sm:$0xff]  }
  0x94   : > { %2195 = vmatprep.subr.bf16.mxu1 %v2537_v42  ;;  %1352 = vmatprep.mubr.bf16.mxu0 %v2552_v57  ;;  %v2607_v42 = vld [vmem:[%s3010_s12 + $0x2c8] sm:$0xff]  }
  0x95   : > { %1401 = vmatprep.mubr.bf16.mxu1 %v2554_v58 }
  0x96   : > { %2168 = vmatpush3.bf16.msra.mxu0 %v2538_v43  ;;  %v2608_v43 = vld [vmem:[%s3010_s12 + $0x208] sm:$0xff]  }
  0x97   : > { %2196 = vmatpush3.bf16.msra.mxu1 %v2539_v44  ;;  %2169 = vmatprep.subr.bf16.mxu0 %v2540_v45  ;;  %v2609_v44 = vld [vmem:[%s3010_s12 + $0x288] sm:$0xff]   ;;  %v2610_v45 = vld [vmem:[%s3010_s12 + $0x240] sm:$0xff]  }
  0x98   : > { %2197 = vmatprep.subr.bf16.mxu1 %v2541_v46  ;;  %v2611_v46 = vld [vmem:[%s3010_s12 + $0x2c0] sm:$0xff]  }
  0x99   : > { %1353 = vmatmul.mubr.bf16.gmra.mxu0 %v2556_v59 }
  0x9a   : > { %2170 = vmatpush3.bf16.msra.mxu0 %v2542_v47  ;;  %1402 = vmatmul.mubr.bf16.gmra.mxu1 %v2557_v60  ;;  %v2612_v47 = vld [vmem:[%s3010_s12 + $0x200] sm:$0xff]  }
  0x9b   : > { %2198 = vmatpush3.bf16.msra.mxu1 %v2543_v48  ;;  %2171 = vmatprep.subr.bf16.mxu0 %v2544_v49  ;;  %v2613_v48 = vld [vmem:[%s3010_s12 + $0x280] sm:$0xff]  }
  0x9c   : > { %2199 = vmatprep.subr.bf16.mxu1 %v2545_v50  ;;  %1442 = vmatprep.mubr.bf16.mxu0 %v2572_v10  ;;  %v2614_v49 = vld [vmem:[%s3003_s19 + $0x20] ss:$48 sps:$4 sm:$0xff]   ;;  %v2616_v50 = vld [vmem:[%s3003_s19 + $0x24] ss:$48 sps:$4 sm:$0xff]  }
  0x9d   : > { %1491 = vmatprep.mubr.bf16.mxu1 %v2575_v12 }
  0x9e   : > { %2172 = vmatpush3.bf16.msra.mxu0 %v2546_v51  ;;  %v2617_v51 = vld [vmem:[%s3003_s19 + $0x28] ss:$48 sps:$4 sm:$0xff]  }
  0x9f   : > { %2200 = vmatpush3.bf16.msra.mxu1 %v2547_v52  ;;  %2173 = vmatprep.subr.bf16.mxu0 %v2548_v53  ;;  %v2619_v52 = vld [vmem:[%s3003_s19 + $0x2c] ss:$48 sps:$4 sm:$0xff]   ;;  %v2620_v53 = vld [vmem:[%s3003_s19 + $0x84] ss:$48 sps:$4 sm:$0xff]  }
  0xa0   : > { %2201 = vmatprep.subr.bf16.mxu1 %v2549_v54  ;;  %v2622_v54 = vld [vmem:[%s3003_s19 + $0x8c] ss:$48 sps:$4 sm:$0xff]  }
  0xa2   : > { %2174 = vmatpush3.bf16.msra.mxu0 %v2550_v55  ;;  %v2624_v55 = vld [vmem:[%s3003_s19 + $0x80] ss:$48 sps:$4 sm:$0xff]  }
  0xa3   : > { %2202 = vmatpush3.bf16.msra.mxu1 %v2551_v56  ;;  %2175 = vmatprep.subr.bf16.mxu0 %v2558_v61  ;;  %v2625_v56 = vld [vmem:[%s3003_s19 + $0x88] ss:$48 sps:$4 sm:$0xff]  }
  0xa4   : > { %2203 = vmatprep.subr.bf16.mxu1 %v2559_v62 }
  0xa6   : > { %2176 = vmatpush3.bf16.msra.mxu0 %v2560_v63 }
  0xa7   : > { %2204 = vmatpush3.bf16.msra.mxu1 %v2561_v0  ;;  %2177 = vmatprep.subr.bf16.mxu0 %v2562_v1 }
  0xa8   : > { %2205 = vmatprep.subr.bf16.mxu1 %v2563_v2 }
  0xaa   : > { %2178 = vmatpush3.bf16.msra.mxu0 %v2564_v3 }
  0xab   : > { %2206 = vmatpush3.bf16.msra.mxu1 %v2565_v4  ;;  %2179 = vmatprep.subr.bf16.mxu0 %v2566_v5 }
  0xac   : > { %2207 = vmatprep.subr.bf16.mxu1 %v2567_v6 }
  0xae   : > { %2180 = vmatpush3.bf16.msra.mxu0 %v2568_v7 }
  0xaf   : > { %2208 = vmatpush3.bf16.msra.mxu1 %v2569_v8  ;;  %2221 = vmatprep.subr.bf16.mxu0 %v2576_v13 }
  0xb0   : > { %2249 = vmatprep.subr.bf16.mxu1 %v2577_v14 }
  0xb1   : > { %1443 = vmatmul.mubr.bf16.vlgmr.msra.gmra.mxu0 %v2570_v9 }
  0xb2   : > { %1492 = vmatmul.mubr.bf16.vlgmr.msra.gmra.mxu1 %v2573_v11  ;;  %2222 = vmatpush3.bf16.msra.mxu0 %v2578_v15 }
  0xb3   : > { %2250 = vmatpush3.bf16.msra.mxu1 %v2579_v16  ;;  %2223 = vmatprep.subr.bf16.mxu0 %v2580_v17 }
  0xb4   : > { %2251 = vmatprep.subr.bf16.mxu1 %v2581_v18  ;;  %1450 = vmatprep.mubr.bf16.mxu0 %v2584_v21 }
  0xb5   : > { %1499 = vmatprep.mubr.bf16.mxu1 %v2589_v25 }
  0xb6   : > { %2224 = vmatpush3.bf16.msra.mxu0 %v2582_v19 }
  0xb7   : > { %2252 = vmatpush3.bf16.msra.mxu1 %v2583_v20  ;;  %2225 = vmatprep.subr.bf16.mxu0 %v2587_v23 }
  0xb8   : > { %2253 = vmatprep.subr.bf16.mxu1 %v2588_v24 }
  0xb9   : > { %1451 = vmatmul.mubr.bf16.gmra.mxu0 %v2586_v22 }
  0xba   : > { %2226 = vmatpush3.bf16.msra.mxu0 %v2591_v26  ;;  %1500 = vmatmul.mubr.bf16.gmra.mxu1 %v2593_v28 }
  0xbb   : > { %2254 = vmatpush3.bf16.msra.mxu1 %v2592_v27  ;;  %2227 = vmatprep.subr.bf16.mxu0 %v2594_v29 }
  0xbc   : > { %2255 = vmatprep.subr.bf16.mxu1 %v2595_v30  ;;  %1540 = vmatprep.mubr.bf16.mxu0 %v2616_v50 }
  0xbd   : > { %1589 = vmatprep.mubr.bf16.mxu1 %v2619_v52 }
  0xbe   : > { %2228 = vmatpush3.bf16.msra.mxu0 %v2596_v31 }
  0xbf   : > { %2256 = vmatpush3.bf16.msra.mxu1 %v2597_v32  ;;  %2229 = vmatprep.subr.bf16.mxu0 %v2598_v33 }
  0xc0   : > { %2257 = vmatprep.subr.bf16.mxu1 %v2599_v34 }
  0xc2   : > { %2230 = vmatpush3.bf16.msra.mxu0 %v2600_v35 }
  0xc3   : > { %2258 = vmatpush3.bf16.msra.mxu1 %v2601_v36  ;;  %2231 = vmatprep.subr.bf16.mxu0 %v2602_v37 }
  0xc4   : > { %2259 = vmatprep.subr.bf16.mxu1 %v2603_v38 }
  0xc6   : > { %2232 = vmatpush3.bf16.msra.mxu0 %v2604_v39 }
  0xc7   : > { %2260 = vmatpush3.bf16.msra.mxu1 %v2605_v40  ;;  %2233 = vmatprep.subr.bf16.mxu0 %v2606_v41 }
  0xc8   : > { %2261 = vmatprep.subr.bf16.mxu1 %v2607_v42 }
  0xca   : > { %2234 = vmatpush3.bf16.msra.mxu0 %v2608_v43 }
  0xcb   : > { %2262 = vmatpush3.bf16.msra.mxu1 %v2609_v44  ;;  %2235 = vmatprep.subr.bf16.mxu0 %v2610_v45 }
  0xcc   : > { %2263 = vmatprep.subr.bf16.mxu1 %v2611_v46 }
  0xce   : > { %2236 = vmatpush3.bf16.msra.mxu0 %v2612_v47 }
  0xcf   : > { %2264 = vmatpush3.bf16.msra.mxu1 %v2613_v48 }
  0xd1   : > { %1541 = vmatmul.mubr.bf16.vlgmr.msra.gmra.mxu0 %v2614_v49 }
  0xd2   : > { %1590 = vmatmul.mubr.bf16.vlgmr.msra.gmra.mxu1 %v2617_v51  ;;  %1548 = vmatprep.mubr.bf16.mxu0 %v2620_v53 }
  0xd3   : > { %1597 = vmatprep.mubr.bf16.mxu1 %v2622_v54  ;;  %v396_v54 = vld [vmem:[#allocation2 + $0x10] sm:$0xff] }
  0xd9   : > { %1549 = vmatmul.mubr.bf16.gmra.mxu0 %v2624_v55 }
  0xda   : > { %1598 = vmatmul.mubr.bf16.gmra.mxu1 %v2625_v56 }
 0x151   : > { %v2125_v57 = vpop.f32.mrf.mxu0 }
 0x152   : > { %v2153_v58 = vpop.f32.mrf.mxu1 }
 0x153   : > { %v2126_v59 = vpop.f32.mrf.mxu0 }
 0x154   : > { %v2154_v60 = vpop.f32.mrf.mxu1  ;;  %v2127_v21 = vadd.f32 %v2126_v59, %v2125_v57 }
 0x155   : > { %v2128_v61 = vpop.f32.mrf.mxu0  ;;  %v2155_v22 = vadd.f32 %v2154_v60, %v2153_v58 }
 0x156   : > { %v2156_v62 = vpop.f32.mrf.mxu1 }
 0x157   : > { %v2129_v63 = vpop.f32.mrf.mxu0  ;;  %v1396_v28 = vadd.f32 %v2155_v22, %v2127_v21 }
 0x158   : > { %v2157_v1 = vpop.f32.mrf.mxu1  ;;  %v2130_v25 = vadd.f32 %v2129_v63, %v2128_v61 }
 0x159   : > { %v2131_v0 = vpop.f32.mrf.mxu0  ;;  %v2158_v26 = vadd.f32 %v2157_v1, %v2156_v62 }
 0x15a   : > { %v2159_v2 = vpop.f32.mrf.mxu1 }
 0x15b   : > { %v2132_v3 = vpop.f32.mrf.mxu0  ;;  %v1399_v33 = vadd.f32 %v2158_v26, %v2130_v25  ;;  %v399_v26 = vld [vmem:[#allocation2 + $0x8] sm:$0xff] }
 0x15c   : > { %v2160_v4 = vpop.f32.mrf.mxu1  ;;  %v2133_v36 = vadd.f32 %v2132_v3, %v2131_v0 }
 0x15d   : > { %v2134_v5 = vpop.f32.mrf.mxu0  ;;  %v2161_v37 = vadd.f32 %v2160_v4, %v2159_v2  ;;  %v397_v4 = vld [vmem:[#allocation2] sm:$0xff] }
 0x15e   : > { %v2162_v6 = vpop.f32.mrf.mxu1 }
 0x15f   : > { %v2135_v7 = vpop.f32.mrf.mxu0  ;;  %v1404_v49 = vadd.f32 %v2161_v37, %v2133_v36 }
 0x160   : > { %v2163_v9 = vpop.f32.mrf.mxu1  ;;  %v2136_v44 = vadd.f32 %v2135_v7, %v2134_v5 }
 0x161   : > { %v2164_v45 = vadd.f32 %v2163_v9, %v2162_v6 }
 0x163   : > { %v1407_v61 = vadd.f32 %v2164_v45, %v2136_v44 }
 0x171   : > { %v2181_v8 = vpop.f32.mrf.mxu0 }
 0x172   : > { %v2209_v10 = vpop.f32.mrf.mxu1 }
 0x173   : > { %v2182_v11 = vpop.f32.mrf.mxu0 }
 0x174   : > { %v2210_v12 = vpop.f32.mrf.mxu1  ;;  %v2183_v24 = vadd.f32 %v2182_v11, %v2181_v8 }
 0x175   : > { %v2184_v13 = vpop.f32.mrf.mxu0  ;;  %v2211_v32 = vadd.f32 %v2210_v12, %v2209_v10 }
 0x176   : > { %v2212_v14 = vpop.f32.mrf.mxu1  ;;  %v1445_v31 = vadd.f32 %v2183_v24, %v1396_v28 }
 0x177   : > { %v2185_v15 = vpop.f32.mrf.mxu0 }
 0x178   : > { %v2213_v16 = vpop.f32.mrf.mxu1  ;;  %v2186_v29 = vadd.f32 %v2185_v15, %v2184_v13  ;;  %v1494_v41 = vadd.f32 %v2211_v32, %v1445_v31 }
 0x179   : > { %v2187_v17 = vpop.f32.mrf.mxu0  ;;  %v2214_v46 = vadd.f32 %v2213_v16, %v2212_v14  ;;  %v398_v16 = vld [vmem:[#allocation2 + $0x18] sm:$0xff] }
 0x17a   : > { %v2215_v18 = vpop.f32.mrf.mxu1  ;;  %v1448_v38 = vadd.f32 %v2186_v29, %v1399_v33 }
 0x17b   : > { %v2188_v19 = vpop.f32.mrf.mxu0 }
 0x17c   : > { %v2216_v20 = vpop.f32.mrf.mxu1  ;;  %v2189_v42 = vadd.f32 %v2188_v19, %v2187_v17  ;;  %v1497_v52 = vadd.f32 %v2214_v46, %v1448_v38 }
 0x17d   : > { %v2190_v23 = vpop.f32.mrf.mxu0  ;;  %v2217_v58 = vadd.f32 %v2216_v20, %v2215_v18 }
 0x17e   : > { %v2218_v27 = vpop.f32.mrf.mxu1  ;;  %v1453_v57 = vadd.f32 %v2189_v42, %v1404_v49 }
 0x17f   : > { %v2191_v30 = vpop.f32.mrf.mxu0 }
 0x180   : > { %v2219_v34 = vpop.f32.mrf.mxu1  ;;  %v2192_v53 = vadd.f32 %v2191_v30, %v2190_v23  ;;  %v1502_v7 = vadd.f32 %v2217_v58, %v1453_v57 }
 0x181   : > { %v2220_v8 = vadd.f32 %v2219_v34, %v2218_v27 }
 0x182   : > { %v1456_v3 = vadd.f32 %v2192_v53, %v1407_v61 }
 0x184   : > { %v1505_v19 = vadd.f32 %v2220_v8, %v1456_v3 }
 0x191   : > { %v2237_v35 = vpop.f32.mrf.mxu0 }
 0x192   : > { %v2265_v39 = vpop.f32.mrf.mxu1 }
 0x193   : > { %v2238_v40 = vpop.f32.mrf.mxu0 }
 0x194   : > { %v2239_v43 = vadd.f32 %v2238_v40, %v2237_v35  ;;  %v2266_v47 = vpop.f32.mrf.mxu1 }
 0x195   : > { %v2240_v48 = vpop.f32.mrf.mxu0  ;;  %v2267_v51 = vadd.f32 %v2266_v47, %v2265_v39 }
 0x196   : > { %v1543_v50 = vadd.f32 %v2239_v43, %v1494_v41  ;;  %v2268_v55 = vpop.f32.mrf.mxu1 }
 0x197   : > { %v2241_v56 = vpop.f32.mrf.mxu0 }
 0x198   : > { %v1592_v59 = vadd.f32 %v2267_v51, %v1543_v50  ;;  %v2242_v60 = vadd.f32 %v2241_v56, %v2240_v48  ;;  %v2269_v62 = vpop.f32.mrf.mxu1 }
 0x199   : > { %v2243_v63 = vpop.f32.mrf.mxu0  ;;  %v2270_v2 = vadd.f32 %v2269_v62, %v2268_v55 }
 0x19a   : > { %v1606_v0 = vadd.f32 %v1592_v59, %v396_v54  ;;  %v1546_v1 = vadd.f32 %v2242_v60, %v1497_v52  ;;  %v2271_v5 = vpop.f32.mrf.mxu1 }
 0x19b   : > { %v2244_v6 = vpop.f32.mrf.mxu0 }
 0x19c   : > { %1610 = vst [vmem:[#allocation2 + $0x10] sm:$0xff] %v1606_v0  ;;  %v1595_v9 = vadd.f32 %v2270_v2, %v1546_v1  ;;  %v2245_v10 = vadd.f32 %v2244_v6, %v2243_v63  ;;  %v2272_v11 = vpop.f32.mrf.mxu1 }
 0x19d   : > { %v2246_v12 = vpop.f32.mrf.mxu0  ;;  %v2273_v15 = vadd.f32 %v2272_v11, %v2271_v5 }
 0x19e   : > { %v1607_v13 = vadd.f32 %v1595_v9, %v397_v4  ;;  %v1551_v14 = vadd.f32 %v2245_v10, %v1502_v7  ;;  %v2274_v17 = vpop.f32.mrf.mxu1 }
 0x19f   : > { %v2247_v18 = vpop.f32.mrf.mxu0 }
 0x1a0   : > { %1611 = vst [vmem:[#allocation2] sm:$0xff] %v1607_v13  ;;  %v1600_v20 = vadd.f32 %v2273_v15, %v1551_v14  ;;  %v2248_v21 = vadd.f32 %v2247_v18, %v2246_v12  ;;  %v2275_v22 = vpop.f32.mrf.mxu1 }
 0x1a1   : > { %v2276_v25 = vadd.f32 %v2275_v22, %v2274_v17 }
 0x1a2   : > { %v1608_v23 = vadd.f32 %v1600_v20, %v398_v16  ;;  %v1554_v24 = vadd.f32 %v2248_v21, %v1505_v19 }
 0x1a4   : > { %1612 = vst [vmem:[#allocation2 + $0x18] sm:$0xff] %v1608_v23  ;;  %v1603_v27 = vadd.f32 %v2276_v25, %v1554_v24  ;;  %1617 = sbr.rel (%p2100_p1) target bundleno = 860 (0x35c), region = 72 }
 0x1a6   : > { %v1609_v28 = vadd.f32 %v1603_v27, %v399_v26 }
 0x1a8   : > { %1613 = vst [vmem:[#allocation2 + $0x8] sm:$0xff] %v1609_v28 }
 0x1a9   : > { %v1641_v29 = vld [vmem:[#allocation8 + $0x78] sm:$0xff]  ;;  %v1640_v30 = vld [vmem:[#allocation8 + $0x70] sm:$0xff]  ;;  %v1639_v31 = vld [vmem:[#allocation8 + $0x68] sm:$0xff] }
 0x1aa   : > { %2317 = vmatprep.subr.mxu0 %v1641_v29  ;;  %v1638_v32 = vld [vmem:[#allocation8 + $0x60] sm:$0xff]  ;;  %v1618_v33 = vld [vmem:[#allocation2 + $0x10] sm:$0xff]  ;;  %v1637_v34 = vld [vmem:[#allocation8 + $0x58] sm:$0xff] }
 0x1ab   : > { %2318 = vmatpush3.msra.mxu0 %v1641_v29  ;;  %v1622_v35 = vmax.f32 %v1618_v33, 0.0  ;;  %v1753_v36 = vld [vmem:[#allocation9 + $0x78] sm:$0xff]  ;;  %v1752_v37 = vld [vmem:[#allocation9 + $0x70] sm:$0xff]  ;;  %v1751_v39 = vld [vmem:[#allocation9 + $0x68] sm:$0xff] }
 0x1ac   : > { %2319 = vmatprep.subr.mxu0 %v1640_v30  ;;  %2355 = vmatprep.subr.mxu1 %v1753_v36  ;;  %v1636_v38 = vld [vmem:[#allocation8 + $0x50] sm:$0xff]  ;;  %v1635_v40 = vld [vmem:[#allocation8 + $0x48] sm:$0xff]  ;;  %v1750_v41 = vld [vmem:[#allocation9 + $0x60] sm:$0xff] }
 0x1ad   : > { %2320 = vmatpush3.msra.mxu0 %v1640_v30  ;;  %2349 = vmatprep.mubr.f32.mxu0 %v1622_v35  ;;  %v1634_v42 = vld [vmem:[#allocation8 + $0x40] sm:$0xff]  ;;  %v1749_v43 = vld [vmem:[#allocation9 + $0x58] sm:$0xff]  ;;  %v1748_v45 = vld [vmem:[#allocation9 + $0x50] sm:$0xff] }
 0x1ae   : > { %2321 = vmatprep.subr.mxu0 %v1639_v31  ;;  %2356 = vmatpush3.msra.mxu1 %v1753_v36  ;;  %v1633_v44 = vld [vmem:[#allocation8 + $0x38] sm:$0xff]  ;;  %v1632_v46 = vld [vmem:[#allocation8 + $0x30] sm:$0xff]  ;;  %v1747_v47 = vld [vmem:[#allocation9 + $0x48] sm:$0xff] }
 0x1af   : > { %2322 = vmatpush3.msra.mxu0 %v1639_v31  ;;  %2357 = vmatprep.subr.mxu1 %v1752_v37  ;;  %v1631_v48 = vld [vmem:[#allocation8 + $0x28] sm:$0xff]  ;;  %v1746_v49 = vld [vmem:[#allocation9 + $0x40] sm:$0xff]  ;;  %v1745_v51 = vld [vmem:[#allocation9 + $0x38] sm:$0xff] }
 0x1b0   : > { %2323 = vmatprep.subr.mxu0 %v1638_v32  ;;  %2358 = vmatpush3.msra.mxu1 %v1752_v37  ;;  %v1630_v50 = vld [vmem:[#allocation8 + $0x20] sm:$0xff]  ;;  %v1629_v52 = vld [vmem:[#allocation8 + $0x18] sm:$0xff]  ;;  %v1744_v53 = vld [vmem:[#allocation9 + $0x30] sm:$0xff] }
 0x1b1   : > { %2324 = vmatpush3.msra.mxu0 %v1638_v32  ;;  %2359 = vmatprep.subr.mxu1 %v1751_v39  ;;  %v1628_v54 = vld [vmem:[#allocation8 + $0x10] sm:$0xff]  ;;  %v1743_v55 = vld [vmem:[#allocation9 + $0x28] sm:$0xff]  ;;  %v1619_v57 = vld [vmem:[#allocation2] sm:$0xff] }
 0x1b2   : > { %2325 = vmatprep.subr.mxu0 %v1637_v34  ;;  %2360 = vmatpush3.msra.mxu1 %v1751_v39  ;;  %v1627_v56 = vld [vmem:[#allocation8 + $0x8] sm:$0xff]  ;;  %v1620_v58 = vld [vmem:[#allocation2 + $0x18] sm:$0xff]  ;;  %v1742_v59 = vld [vmem:[#allocation9 + $0x20] sm:$0xff]  ;;  %v1623_v61 = vmax.f32 %v1619_v57, 0.0 }
 0x1b3   : > { %2326 = vmatpush3.msra.mxu0 %v1637_v34  ;;  %2361 = vmatprep.subr.mxu1 %v1750_v41  ;;  %v1626_v60 = vld [vmem:[#allocation8] sm:$0xff]  ;;  %v1624_v62 = vmax.f32 %v1620_v58, 0.0  ;;  %v1621_v63 = vld [vmem:[#allocation2 + $0x8] sm:$0xff]  ;;  %v1741_v1 = vld [vmem:[#allocation9 + $0x18] sm:$0xff] }
 0x1b4   : > { %2327 = vmatprep.subr.mxu0 %v1636_v38  ;;  %2362 = vmatpush3.msra.mxu1 %v1750_v41  ;;  %v1625_v0 = vmax.f32 %v1621_v63, 0.0  ;;  %v1740_v2 = vld [vmem:[#allocation9 + $0x10] sm:$0xff]  ;;  %v1739_v3 = vld [vmem:[#allocation9 + $0x8] sm:$0xff]  ;;  %v1738_v4 = vld [vmem:[#allocation9] sm:$0xff] }
 0x1b5   : > { %2328 = vmatpush3.msra.mxu0 %v1636_v38  ;;  %2363 = vmatprep.subr.mxu1 %v1749_v43  ;;  %v2101_v5 = vld [vmem:[%s3189_s4] ss:$0 sm:$0xff] }
 0x1b6   : > { %2329 = vmatprep.subr.mxu0 %v1635_v40  ;;  %2364 = vmatpush3.msra.mxu1 %v1749_v43  ;;  %v2102_v18 = vld [vmem:[%s3191_s6] ss:$0 sm:$0xff] }
 0x1b7   : > { %2330 = vmatpush3.msra.mxu0 %v1635_v40  ;;  %2365 = vmatprep.subr.mxu1 %v1748_v45 }
 0x1b8   : > { %2331 = vmatprep.subr.mxu0 %v1634_v42  ;;  %2366 = vmatpush3.msra.mxu1 %v1748_v45 }
 0x1b9   : > { %2332 = vmatpush3.msra.mxu0 %v1634_v42  ;;  %2367 = vmatprep.subr.mxu1 %v1747_v47 }
 0x1ba   : > { %2333 = vmatprep.subr.mxu0 %v1633_v44  ;;  %2368 = vmatpush3.msra.mxu1 %v1747_v47 }
 0x1bb   : > { %2334 = vmatpush3.msra.mxu0 %v1633_v44  ;;  %2369 = vmatprep.subr.mxu1 %v1746_v49 }
 0x1bc   : > { %2335 = vmatprep.subr.mxu0 %v1632_v46  ;;  %2370 = vmatpush3.msra.mxu1 %v1746_v49 }
 0x1bd   : > { %2336 = vmatpush3.msra.mxu0 %v1632_v46  ;;  %2371 = vmatprep.subr.mxu1 %v1745_v51 }
 0x1be   : > { %2337 = vmatprep.subr.mxu0 %v1631_v48  ;;  %2372 = vmatpush3.msra.mxu1 %v1745_v51 }
 0x1bf   : > { %2338 = vmatpush3.msra.mxu0 %v1631_v48  ;;  %2373 = vmatprep.subr.mxu1 %v1744_v53 }
 0x1c0   : > { %2339 = vmatprep.subr.mxu0 %v1630_v50  ;;  %2374 = vmatpush3.msra.mxu1 %v1744_v53 }
 0x1c1   : > { %2340 = vmatpush3.msra.mxu0 %v1630_v50  ;;  %2375 = vmatprep.subr.mxu1 %v1743_v55 }
 0x1c2   : > { %2341 = vmatprep.subr.mxu0 %v1629_v52  ;;  %2376 = vmatpush3.msra.mxu1 %v1743_v55 }
 0x1c3   : > { %2342 = vmatpush3.msra.mxu0 %v1629_v52  ;;  %2377 = vmatprep.subr.mxu1 %v1742_v59 }
 0x1c4   : > { %2343 = vmatprep.subr.mxu0 %v1628_v54  ;;  %2378 = vmatpush3.msra.mxu1 %v1742_v59 }
 0x1c5   : > { %2344 = vmatpush3.msra.mxu0 %v1628_v54  ;;  %2379 = vmatprep.subr.mxu1 %v1741_v1 }
 0x1c6   : > { %2345 = vmatprep.subr.mxu0 %v1627_v56  ;;  %2380 = vmatpush3.msra.mxu1 %v1741_v1 }
 0x1c7   : > { %2346 = vmatpush3.msra.mxu0 %v1627_v56  ;;  %2381 = vmatprep.subr.mxu1 %v1740_v2 }
 0x1c8   : > { %2347 = vmatprep.subr.mxu0 %v1626_v60  ;;  %2382 = vmatpush3.msra.mxu1 %v1740_v2 }
 0x1c9   : > { %2348 = vmatpush3.msra.mxu0 %v1626_v60  ;;  %2383 = vmatprep.subr.mxu1 %v1739_v3 }
 0x1ca   : > { %2350 = vmatmul.mubr.f32.vlgmr.msra.gmra.mxu0 %v1623_v61  ;;  %2384 = vmatpush3.msra.mxu1 %v1739_v3 }
 0x1cb   : > { %2352 = vmatprep.mubr.f32.mxu0 %v1624_v62  ;;  %2385 = vmatprep.subr.mxu1 %v1738_v4 }
 0x1cc   : > { %2386 = vmatpush3.msra.mxu1 %v1738_v4 }
 0x1ce   : > { %2353 = vmatmul.mubr.f32.gmra.mxu0 %v1625_v0 }
 0x28a   : > { %v2351_v6 = vpop.f32.mrf.mxu0 }
 0x28b   : > { %v1721_v7 = vadd.f32 %v2351_v6, %v2101_v5 }
 0x28c   : > { %v1715_v8 = vpop.f32.mrf.mxu0 }
 0x28d   : > { %v1716_v9 = vadd.f32 %v2101_v5, %v1715_v8  ;;  %v1735_v12 = vmax.f32 %v1721_v7, 0.0 }
 0x28e   : > { %v2354_v10 = vpop.f32.mrf.mxu0 }
 0x28f   : > { %v1734_v11 = vmax.f32 %v1716_v9, 0.0  ;;  %v1731_v13 = vadd.f32 %v2354_v10, %v2101_v5 }
 0x290   : > { %v1725_v14 = vpop.f32.mrf.mxu0 }
 0x291   : > { %v1726_v15 = vadd.f32 %v2101_v5, %v1725_v14  ;;  %2387 = vmatprep.mubr.f32.mxu1 %v1734_v11  ;;  %v1737_v17 = vmax.f32 %v1731_v13, 0.0 }
 0x292   : > { %2388 = vmatmul.mubr.f32.vlgmr.msra.gmra.mxu1 %v1735_v12 }
 0x293   : > { %v1736_v16 = vmax.f32 %v1726_v15, 0.0 }
 0x295   : > { %2390 = vmatprep.mubr.f32.mxu1 %v1736_v16 }
 0x296   : > { %2391 = vmatmul.mubr.f32.gmra.mxu1 %v1737_v17 }
 0x352   : > { %v2389_v19 = vpop.f32.mrf.mxu1 }
 0x353   : > { %v1833_v20 = vadd.f32 %v2389_v19, %v2102_v18 }
 0x354   : > { %v1827_v21 = vpop.f32.mrf.mxu1 }
 0x355   : > { %1847 = vst [vmem:[#allocation11 + $0x8] sm:$0xff] %v1833_v20  ;;  %v1828_v22 = vadd.f32 %v2102_v18, %v1827_v21 }
 0x356   : > { %v2392_v23 = vpop.f32.mrf.mxu1 }
 0x357   : > { %1846 = vst [vmem:[#allocation11] sm:$0xff] %v1828_v22  ;;  %v1843_v24 = vadd.f32 %v2392_v23, %v2102_v18 }
 0x358   : > { %v1837_v25 = vpop.f32.mrf.mxu1 }
 0x359   : > { %1849 = vst [vmem:[#allocation11 + $0x18] sm:$0xff] %v1843_v24  ;;  %v1838_v26 = vadd.f32 %v2102_v18, %v1837_v25 }
 0x35b   : > { %1848 = vst [vmem:[#allocation11 + $0x10] sm:$0xff] %v1838_v26 }
 0x35c PF: > { %p2432_p5 = scmp.eq.s32.totalorder %s2909_s30, 1  ;;  %s2837_s22 = smov [#allocation11]  }
 0x35d   : > { %s1859_s23 = sshll.u32 %s2837_s22, 4  ;;  %s1860_s23 = int_to_ptr.vmem [resolvable:$true] %s1859_s23 }
 0x35e   : > { %s2734_s17 = scalar_lea.vmem %s1860_s23, 512  ;;  %p2741_p13 = scmp.lt.s32.totalorder %s1860_s23, %s1860_s23 }
 0x35f   : > { %p2735_p2 = scmp.ne.s32.totalorder %s1860_s23, %s2734_s17  ;;  %p2742_p7 = scmp.lt.s32.totalorder %s2734_s17, %s2734_s17 }
 0x361   : > { %p2736_p3 = pnand %p2735_p2, %p2432_p5  ;;  %p2743_p9 = por %p2742_p7, %p2741_p13 }
 0x363   : > { %p2737_p6 = pneg %p2736_p3 }
 0x365   : > { %p2744_p11 = pnand %p2743_p9, %p2737_p6 }
 0x367   : > { %2747 = shalt.err (!%p2744_p11)
}
 0x368   : > { %s2838_s13 = smov 128   ;;  %s2839_s24 = smov 8  }
 0x369   : > { %s3216_s0 = sld [smem:[#allocation23_spill]] }
 0x36f   : > { %2410 = dma.vmem_to_hbm [thread:$0]  (%p2432_p5), %s1860_s23, 512, %s3216_s0, [#allocation5], %s2838_s13, %s2838_s13, %s2839_s24  }
 0x370   : > { %2799 = dma.done.wait (%p2432_p5), [#allocation5], 512  }
 0x371   : > { %2801 = vsyncadd (%p2432_p5), [#allocation5], 4294966784 }
 0x372 PF: > { %s25_s29 = sadd.s32 1, %s2824_s29   ;;  %s3217_s3 = sld [smem:[#allocation17_spill]] }
 0x373   : > { %p22_p8 = scmp.ge.s32.totalorder %s25_s29, 4   ;;  %s3218_s26 = sld [smem:[#allocation19_spill]] }
 0x374   : > { %s3219_s11 = sld [smem:[#allocation18_spill]]  ;;  %s3220_s24 = smov %s2808_s25 }
 0x375   : > { %s3222_s27 = smov %s2820_s28 }
 0x376   :  { %24 = sbr.rel (!%p22_p8) target bundleno = 13 (0xd), region = 115 }
 0x378   : > { %s3221_s25 = smov %s3217_s3 }
 0x37a   : > { %s3223_s28 = smov %s3219_s11 }
 0x37b   :  { %1875 = vsyncpa [#allocation4], 1 }
 0x37c   :  { %1877 = vsyncpa [#allocation4 + $0x1], 1 }
 0x37d   :  { %1878 = vsyncpa [#allocation7], 1 }
 0x37e   :  { %1880 = vsyncpa [#allocation7 + $0x1], 1 }
 0x37f   :  { %1881 = vsyncpa [#allocation10], 1 }
 0x380   :  { %1882 = vsyncpa [#allocation5], 1 }
 0x381   :  { %1884 = vsyncpa [#allocation5 + $0x1], 1 }

</bundles_post_ra>
